<compile_context>
chip_gen: v7x
topology: tpu7x:2x2x1
jax: 0.10.0
libtpu: 0.0.40
codegen_flags: <defaults>
</compile_context>

<pallas_src>
import functools
import math

import jax
import jax.numpy as jnp
from jax.experimental import pallas as pl
from jax.experimental.pallas import tpu as pltpu


def _round_up(x, m):
    return (x + m - 1) // m * m


# ---------------------------------------------------------------------------
# fused layer kernel:  out = activation( S @ (iw * (H @ W)) + b )
#   grid = (rows/tm, contraction/tk); row axis parallel, contraction arbitrary
# ---------------------------------------------------------------------------
def _layer_kernel(s_ref, h_ref, iw_ref, w_ref, b_ref, o_ref, acc_ref,
                  *, activation):
    k = pl.program_id(1)

    @pl.when(k == 0)
    def _():
        acc_ref[...] = jnp.zeros_like(acc_ref)

    # Prescale for this contraction block: (tk, f_out) = iw * (H_blk @ W).
    # f32 compute, cast to bf16 only for the MXU feed of the big matmul.
    x_blk = iw_ref[...] * jnp.dot(h_ref[...], w_ref[...],
                                  preferred_element_type=jnp.float32)
    acc_ref[...] += jnp.dot(s_ref[...], x_blk.astype(jnp.bfloat16),
                            preferred_element_type=jnp.float32)

    @pl.when(k == pl.num_programs(1) - 1)
    def _():
        m = acc_ref[...] + b_ref[...]
        if activation == "relu":
            o_ref[...] = jnp.maximum(m, 0.0).astype(o_ref.dtype)
        else:  # log_softmax over classes (dim=1)
            mx = jnp.max(m, axis=1, keepdims=True)
            z = m - mx
            lse = jnp.log(jnp.sum(jnp.exp(z), axis=1, keepdims=True))
            o_ref[...] = (z - lse).astype(o_ref.dtype)


def _layer(S_bf16, Hin, iw, W, b, activation, tm, tk):
    Np = S_bf16.shape[0]
    d = Hin.shape[1]
    f_out = W.shape[1]
    assert Np % tm == 0 and Np % tk == 0

    kernel = functools.partial(_layer_kernel, activation=activation)

    n_row_tiles = Np // tm
    flops = 2 * Np * Np * f_out + 2 * Np * d * f_out * n_row_tiles
    bytes_accessed = (Np * Np * 2                         # S stream (bf16)
                      + n_row_tiles * Np * (d + 1) * 4    # H + iw re-streamed per row tile
                      + Np * f_out * 4)                   # output
    transcendentals = Np * f_out if activation == "log_softmax" else 0

    return pl.pallas_call(
        kernel,
        out_shape=jax.ShapeDtypeStruct((Np, f_out), jnp.float32),
        grid_spec=pltpu.PrefetchScalarGridSpec(
            num_scalar_prefetch=0,
            grid=(Np // tm, Np // tk),
            in_specs=[
                pl.BlockSpec((tm, tk), lambda i, k: (i, k)),     # S streamed (bf16)
                pl.BlockSpec((tk, d), lambda i, k: (k, 0)),      # H streamed over k
                pl.BlockSpec((tk, 1), lambda i, k: (k, 0)),      # iw streamed over k
                pl.BlockSpec((d, f_out), lambda i, k: (0, 0)),   # W resident
                pl.BlockSpec((1, f_out), lambda i, k: (0, 0)),   # bias resident
            ],
            out_specs=pl.BlockSpec((tm, f_out), lambda i, k: (i, 0)),
            scratch_shapes=[pltpu.VMEM((tm, f_out), jnp.float32)],
        ),
        compiler_params=pltpu.CompilerParams(
            dimension_semantics=("parallel", "arbitrary")),
        cost_estimate=pl.CostEstimate(
            flops=int(flops),
            transcendentals=int(transcendentals),
            bytes_accessed=int(bytes_accessed)),
    )(S_bf16, Hin, iw, W, b)


def _pick_tiles(N, tm_target=256, tk_target=512):
    """(8,128)-legal tiles with tm | tk so one padded size serves both."""
    if N >= tk_target:
        return tm_target, tk_target
    if N >= tm_target:
        # single contraction block (tk == padded dim, multiple of tm_target)
        return tm_target, _round_up(N, tm_target)
    np8 = _round_up(N, 8)
    return np8, np8          # one block in each direction


def hypermsg_forward(structure, H, input_weight, W1, b1, W2, b2,
                     *, tm=None, tk=None):
    """HyperMSG forward.  structure:(N,N), H:(N,d), input_weight:(N,1),
    W1:(d,h), b1:(1,h), W2:(h,c), b2:(1,c).  Returns log-probs (N,c) f32."""
    N = H.shape[0]
    if tm is None or tk is None:
        tm, tk = _pick_tiles(N)
    Np = _round_up(N, tm * tk // math.gcd(tm, tk))
    pad = Np - N

    # bf16 only for the dominant mem-bound S stream; everything else
    # (features, weights, bias, accumulation, epilogue) stays f32.
    S = jnp.pad(structure.astype(jnp.bfloat16), ((0, pad), (0, pad)))
    Hp = jnp.pad(H.astype(jnp.float32), ((0, pad), (0, 0)))
    iw = jnp.pad(input_weight.astype(jnp.float32), ((0, pad), (0, 0)))
    b1 = b1.astype(jnp.float32).reshape(1, -1)
    b2 = b2.astype(jnp.float32).reshape(1, -1)

    # ---- layer 1: H1 = relu(S @ (iw * (H @ W1)) + b1) ----
    H1 = _layer(S, Hp, iw, W1.astype(jnp.float32), b1, "relu", tm, tk)

    # F.dropout(H1, p, training=self.training) -> identity in eval mode.
    # TODO(synk): training-mode dropout would use pltpu.prng_seed/prng_random_bits.

    # ---- layer 2: out = log_softmax(S @ (iw * (H1 @ W2)) + b2, dim=1) ----
    out = _layer(S, H1, iw, W2.astype(jnp.float32), b2, "log_softmax", tm, tk)
    return out[:N]


def _reference(structure, H, iw, W1, b1, W2, b2):
    h1 = structure @ (iw * (H @ W1)) + b1
    h1 = jnp.maximum(h1, 0.0)
    h2 = structure @ (iw * (h1 @ W2)) + b2
    return jax.nn.log_softmax(h2, axis=1)


if __name__ == "__main__":
    def run_case(N, d, hid, c, seed, tm=None, tk=None):
        key = jax.random.PRNGKey(seed)
        ks = jax.random.split(key, 7)

        # dense symmetric row-normalized structure matrix
        A = jax.random.uniform(ks[0], (N, N), jnp.float32)
        A = 0.5 * (A + A.T)
        A = A / jnp.sum(A, axis=1, keepdims=True)

        H = jax.random.normal(ks[1], (N, d), jnp.float32)
        iw = jax.random.uniform(ks[2], (N, 1), jnp.float32) + 0.5

        W1 = jax.random.normal(ks[3], (d, hid), jnp.float32) / jnp.sqrt(d)
        b1 = jax.random.normal(ks[4], (1, hid), jnp.float32) * 0.01
        W2 = jax.random.normal(ks[5], (hid, c), jnp.float32) / jnp.sqrt(hid)
        b2 = jax.random.normal(ks[6], (1, c), jnp.float32) * 0.01

        out = hypermsg_forward(A, H, iw, W1, b1, W2, b2, tm=tm, tk=tk)
        out = jax.block_until_ready(out)
        ref = _reference(A, H, iw, W1, b1, W2, b2)
        assert out.shape == (N, c)
        # bf16 S stream with f32 accumulation -> relaxed tolerance
        assert jnp.allclose(out, ref, atol=5e-2, rtol=5e-2), \
            f"mismatch vs JAX reference (N={N})"

    # toy problem matching the module defaults (hidden=16), PRNGKey(0)
    run_case(N=16, d=8, hid=16, c=4, seed=0)
    # exercise the tiled path: 2x2 (row x contraction) grid with accumulation
    # across k-steps and zero-padded edge rows/columns
    run_case(N=200, d=8, hid=16, c=4, seed=1, tm=128, tk=128)

    print("KERNEL_OK")
</pallas_src>

<mosaic_0001>
module attributes {stable_mosaic.version = 11 : i64} {
  func.func @_layer_kernel(%arg0: i32, %arg1: i32, %arg2: memref<16x16xbf16, #tpu.memory_space<vmem>>, %arg3: memref<16x8xf32, #tpu.memory_space<vmem>>, %arg4: memref<16x1xf32, #tpu.memory_space<vmem>>, %arg5: memref<8x16xf32, #tpu.memory_space<vmem>>, %arg6: memref<1x16xf32, #tpu.memory_space<vmem>>, %arg7: memref<16x16xf32, #tpu.memory_space<vmem>>, %arg8: memref<16x16xf32, #tpu.memory_space<vmem>>) attributes {dimension_semantics = [#tpu.dimension_semantics<parallel>, #tpu.dimension_semantics<arbitrary>], iteration_bounds = array<i64: 1, 1>, scalar_prefetch = 0 : i64, scratch_operands = 1 : i64, tpu.core_type = #tpu.core_type<tc>, window_params = [{transform_indices = @transform_0, window_bounds = array<i64: 16, 16>}, {transform_indices = @transform_1, window_bounds = array<i64: 16, 8>}, {transform_indices = @transform_2, window_bounds = array<i64: 16, 1>}, {pipeline_mode = #tpu.pipeline_mode<synchronous>, transform_indices = @transform_3, window_bounds = array<i64: 8, 16>}, {pipeline_mode = #tpu.pipeline_mode<synchronous>, transform_indices = @transform_4, window_bounds = array<i64: 1, 16>}, {transform_indices = @transform_5, window_bounds = array<i64: 16, 16>}]} {
    %c0_i32 = arith.constant 0 : i32
    %0 = arith.cmpi eq, %arg1, %c0_i32 : i32
    %1 = arith.extui %0 : i1 to i32
    %c0_i32_0 = arith.constant 0 : i32
    %2 = arith.cmpi ne, %1, %c0_i32_0 : i32
    scf.if %2 {
      %cst_15 = arith.constant 0.000000e+00 : f32
      %18 = vector.broadcast %cst_15 : f32 to vector<16x16xf32>
      %c0_16 = arith.constant 0 : index
      %c0_17 = arith.constant 0 : index
      %19 = vector.load %arg8[%c0_16, %c0_17] : memref<16x16xf32, #tpu.memory_space<vmem>>, vector<16x16xf32>
      tpu.vector_store %arg8[%c0_16, %c0_17], %18 {strides = array<i32>} : memref<16x16xf32, #tpu.memory_space<vmem>>, vector<16x16xf32>,
    } else {
    }
    %c0 = arith.constant 0 : index
    %c0_1 = arith.constant 0 : index
    %3 = vector.load %arg4[%c0, %c0_1] : memref<16x1xf32, #tpu.memory_space<vmem>>, vector<16x1xf32>
    %c0_2 = arith.constant 0 : index
    %c0_3 = arith.constant 0 : index
    %4 = vector.load %arg3[%c0_2, %c0_3] : memref<16x8xf32, #tpu.memory_space<vmem>>, vector<16x8xf32>
    %c0_4 = arith.constant 0 : index
    %c0_5 = arith.constant 0 : index
    %5 = vector.load %arg5[%c0_4, %c0_5] : memref<8x16xf32, #tpu.memory_space<vmem>>, vector<8x16xf32>
    %cst = arith.constant dense<0.000000e+00> : vector<16x16xf32>
    %6 = tpu.matmul %4, %5, %cst {dimension_numbers = #tpu.dot_dimension_numbers<[1], [0], [0], [1], [0, 0, 1, 1], [], []>} : vector<16x8xf32>, vector<8x16xf32>, vector<16x16xf32> -> vector<16x16xf32>
    %7 = vector.broadcast %3 : vector<16x1xf32> to vector<16x16xf32>
    %8 = arith.mulf %7, %6 : vector<16x16xf32>
    %c0_6 = arith.constant 0 : index
    %c0_7 = arith.constant 0 : index
    %9 = vector.load %arg8[%c0_6, %c0_7] : memref<16x16xf32, #tpu.memory_space<vmem>>, vector<16x16xf32>
    %c0_8 = arith.constant 0 : index
    %c0_9 = arith.constant 0 : index
    %10 = vector.load %arg2[%c0_8, %c0_9] : memref<16x16xbf16, #tpu.memory_space<vmem>>, vector<16x16xbf16>
    %11 = arith.truncf %8 : vector<16x16xf32> to vector<16x16xbf16>
    %cst_10 = arith.constant dense<0.000000e+00> : vector<16x16xf32>
    %12 = tpu.matmul %10, %11, %cst_10 {dimension_numbers = #tpu.dot_dimension_numbers<[1], [0], [0], [1], [0, 0, 1, 1], [], []>} : vector<16x16xbf16>, vector<16x16xbf16>, vector<16x16xf32> -> vector<16x16xf32>
    %13 = arith.addf %9, %12 : vector<16x16xf32>
    %c0_11 = arith.constant 0 : index
    %c0_12 = arith.constant 0 : index
    %14 = vector.load %arg8[%c0_11, %c0_12] : memref<16x16xf32, #tpu.memory_space<vmem>>, vector<16x16xf32>
    tpu.vector_store %arg8[%c0_11, %c0_12], %13 {strides = array<i32>} : memref<16x16xf32, #tpu.memory_space<vmem>>, vector<16x16xf32>,
    %c0_i32_13 = arith.constant 0 : i32
    %15 = arith.cmpi eq, %arg1, %c0_i32_13 : i32
    %16 = arith.extui %15 : i1 to i32
    %c0_i32_14 = arith.constant 0 : i32
    %17 = arith.cmpi ne, %16, %c0_i32_14 : i32
    scf.if %17 {
      %c0_15 = arith.constant 0 : index
      %c0_16 = arith.constant 0 : index
      %18 = vector.load %arg8[%c0_15, %c0_16] : memref<16x16xf32, #tpu.memory_space<vmem>>, vector<16x16xf32>
      %c0_17 = arith.constant 0 : index
      %c0_18 = arith.constant 0 : index
      %19 = vector.load %arg6[%c0_17, %c0_18] : memref<1x16xf32, #tpu.memory_space<vmem>>, vector<1x16xf32>
      %20 = vector.broadcast %19 : vector<1x16xf32> to vector<16x16xf32>
      %21 = arith.addf %18, %20 : vector<16x16xf32>
      %cst_19 = arith.constant 0.000000e+00 : f32
      %22 = vector.broadcast %cst_19 : f32 to vector<16x16xf32>
      %23 = arith.maximumf %21, %22 : vector<16x16xf32>
      %c0_20 = arith.constant 0 : index
      %c0_21 = arith.constant 0 : index
      %24 = vector.load %arg7[%c0_20, %c0_21] : memref<16x16xf32, #tpu.memory_space<vmem>>, vector<16x16xf32>
      tpu.vector_store %arg7[%c0_20, %c0_21], %23 {strides = array<i32>} : memref<16x16xf32, #tpu.memory_space<vmem>>, vector<16x16xf32>,
    } else {
    }
    return
  }
  func.func @transform_0(%arg0: i32, %arg1: i32) -> (i32, i32) {
    %c0_i32 = arith.constant 0 : i32
    return %arg0, %arg1 : i32, i32
  }
  func.func @transform_1(%arg0: i32, %arg1: i32) -> (i32, i32) {
    %c0_i32 = arith.constant 0 : i32
    %c0_i32_0 = arith.constant 0 : i32
    return %arg1, %c0_i32 : i32, i32
  }
  func.func @transform_2(%arg0: i32, %arg1: i32) -> (i32, i32) {
    %c0_i32 = arith.constant 0 : i32
    %c0_i32_0 = arith.constant 0 : i32
    return %arg1, %c0_i32 : i32, i32
  }
  func.func @transform_3(%arg0: i32, %arg1: i32) -> (i32, i32) {
    %c0_i32 = arith.constant 0 : i32
    %c0_i32_0 = arith.constant 0 : i32
    %c0_i32_1 = arith.constant 0 : i32
    return %c0_i32, %c0_i32_0 : i32, i32
  }
  func.func @transform_4(%arg0: i32, %arg1: i32) -> (i32, i32) {
    %c0_i32 = arith.constant 0 : i32
    %c0_i32_0 = arith.constant 0 : i32
    %c0_i32_1 = arith.constant 0 : i32
    return %c0_i32, %c0_i32_0 : i32, i32
  }
  func.func @transform_5(%arg0: i32, %arg1: i32) -> (i32, i32) {
    %c0_i32 = arith.constant 0 : i32
    %c0_i32_0 = arith.constant 0 : i32
    return %arg0, %c0_i32 : i32, i32
  }
}

</mosaic_0001>

<bundles_post_ra>
// kernel: tpu_custom_call.1
= control target key start
LH: loop header
LB: loop body
LE: loop exit
PB: predicated region body
PF: predicated region fallthrough
CT: control target
= control target key end

     0   :  { %vm34_vm0 = vcmask 64512   ;;  %v274_v4 = vmov 0   ;;  %s350_s0 = inlined_call_operand.vmem [shape: bf16[16,16], index: 0, kind: input, shape index: {}]   ;;  %s351_s1 = inlined_call_operand.vmem [shape: f32[16,8], index: 1, kind: input, shape index: {}]   ;;  %s352_s2 = inlined_call_operand.vmem [shape: f32[16,1], index: 2, kind: input, shape index: {}]   ;;  %s353_s3 = inlined_call_operand.vmem [shape: f32[8,16], index: 3, kind: input, shape index: {}]   ;;  %s354_s4 = inlined_call_operand.vmem [shape: f32[1,16], index: 4, kind: input, shape index: {}]   ;;  %s355_s5 = inlined_call_operand.hbm [shape: f32[16,16], index: 5, kind: output, shape index: {}]  }
   0x1   :  { %v33_v0 = vld [vmem:[%s353_s3] sm:$0xff]  ;;  %v32_v2 = vld [vmem:[%s351_s1 + $0x8] sm:$0xff]  ;;  %248 = vset.pattern.permute.xlu0 %v274_v4 }
   0x2   :  { %v31_v1 = vld [vmem:[%s351_s1] sm:$0xff]  ;;  %231 = vmatprep.subr.mxu0 %v33_v0 }
   0x3   :  { %233 = vmatprep.mubr.msk.f32.mxu0 %vm34_vm0, %v31_v1  ;;  %v29_v3 = vld [vmem:[%s352_s2] sm:$0xff]  ;;  %232 = vmatpush3.msra.mxu0 %v33_v0 }
   0x4   :  { %10 = vsyncpa [#allocation4], 0  ;;  %234 = vmatmul.mubr.msk.f32.vlgmr.msra.gmra.mrb[0].mxu0 %vm34_vm0, %v32_v2  ;;  %118 = vperm.xlu0 %248, %v29_v3   ;;  %v30_v5 = vld [vmem:[%s352_s2 + $0x8] sm:$0xff]  ;;  %vm26_vm1 = vcmask 130048   ;;  %v275_v6 = vmov 0.0   ;;  %vm276_vm2 = vmmov 0  }
   0x5   :  { %27 = vst.msk [vmem:[#allocation2] sm:$0xff] %vm26_vm1, %v275_v6  ;;  %28 = vst.msk [vmem:[#allocation2 + $0x8] sm:$0xff] %vm26_vm1, %v275_v6  ;;  %236 = vmatprep.subr.bf16.mxu1 %v275_v6  ;;  %238 = vmatprep.mubr.msk.bf16.mxu1 %vm276_vm2, %v275_v6  ;;  %v249_v14 = vld [vmem:[%s350_s0] sm:$0xff]   ;;  %s277_s0 = smov [#allocation3]  }
   0x6   :  { %v225_v23 = vld [vmem:[%s354_s4] ss:$0 sm:$0xff]  ;;  %s210_s29 = sshll.u32 %s277_s0, 4  ;;  %s211_s29 = int_to_ptr.vmem [resolvable:$true] %s210_s29 }
   0x7   :  { %s250_s30 = scalar_lea.vmem %s211_s29, 256  ;;  %p255_p1 = scmp.lt.s32.totalorder %s211_s29, %s211_s29 }
   0x8   :  { %123 = vperm.xlu0 %248, %v30_v5   ;;  %p251_p0 = scmp.ne.s32.totalorder %s211_s29, %s250_s30  ;;  %p256_p2 = scmp.lt.s32.totalorder %s250_s30, %s250_s30 }
   0xa   :  { %p257_p3 = por %p256_p2, %p255_p1 }
   0xc   :  { %v128_v15 = vld [vmem:[#allocation2] sm:$0xff]  ;;  %v129_v17 = vld [vmem:[#allocation2 + $0x8] sm:$0xff]  ;;  %p258_p4 = pnand %p257_p3, %p251_p0 }
  0x83   :  { %v119_v7 = vpop.permute.xlu0 %118 }
  0x87   :  { %v124_v8 = vpop.permute.xlu0 %123 }
  0xd7   :  { %v235_v9 = vpop.f32.mrb[0].mxu0 }
  0xd8   :  { %v127_v10 = vmul.f32 %v235_v9, %v124_v8  ;;  %v107_v11 = vpop.f32.mrb[1].mxu0 }
  0xd9   :  { %v126_v12 = vmul.f32 %v119_v7, %v107_v11 }
  0xdb   :  { %v132_v13 = vpack.c.bf16 %v127_v10, %v126_v12 }
  0xdd   :  { %237 = vmatpush3.bf16.msra.mxu1 %v132_v13 }
  0xe0   :  { %239 = vmatmul.mubr.msk.bf16.vlgmr.msra.gmra.mrb[0].mxu1 %vm26_vm1, %v249_v14 }
 0x1b3   :  { %v176_v16 = vpop.f32.mrb[0].mxu1 }
 0x1b4   :  { %v183_v18 = vadd.f32 %v176_v16, %v128_v15  ;;  %v240_v19 = vpop.f32.mrb[1].mxu1 }
 0x1b5   :  { %v179_v20 = vpop.f32.mrb[2].mxu1 }
 0x1b6   :  { %185 = vst.msk [vmem:[#allocation2] sm:$0xff] %vm26_vm1, %v183_v18  ;;  %v184_v21 = vadd.f32 %v179_v20, %v129_v17  ;;  %v241_v22 = vpop.f32.mrb[3].mxu1 }
 0x1b8   :  { %186 = vst.msk [vmem:[#allocation2 + $0x8] sm:$0xff] %vm26_vm1, %v184_v21 }
 0x1bd   :  { %v190_v24 = vld [vmem:[#allocation2] sm:$0xff] }
 0x1be   :  { %v199_v25 = vadd.f32 %v225_v23, %v190_v24 }
 0x1bf   :  { %v191_v26 = vld [vmem:[#allocation2 + $0x8] sm:$0xff] }
 0x1c0   :  { %v200_v27 = vadd.f32 %v225_v23, %v191_v26  ;;  %v201_v28 = vmax.f32 %v199_v25, 0.0 }
 0x1c2   :  { %v202_v29 = vmax.f32 %v200_v27, 0.0  ;;  %203 = vst.msk [vmem:[#allocation3] sm:$0xff] %vm26_vm1, %v201_v28 }
 0x1c4   :  { %204 = vst.msk [vmem:[#allocation3 + $0x8] sm:$0xff] %vm26_vm1, %v202_v29 }
 0x1c5   :  { %261 = shalt.err (!%p258_p4)
}
 0x1c6   :  { %s262_s7 = scalar_lea.hbm %s355_s5, 256 }
 0x1c7   :  { %p263_p5 = scmp.ne.s32.totalorder %s355_s5, %s262_s7  ;;  %p266_p6 = scmp.lt.u32.totalorder %s262_s7, %s355_s5 }
 0x1c9   :  { %p268_p7 = pnand %p266_p6, %p263_p5 }
 0x1cb   :  { %271 = shalt.err (!%p268_p7)
}
 0x1cc   :  { %s278_s12 = smov 128   ;;  %s279_s13 = smov 8  }
 0x1cd   :  { %216 = dma.vmem_to_hbm [thread:$0]  %s211_s29, 256, %s355_s5, [#allocation4], %s278_s12, %s278_s12, %s279_s13  }
 0x1ce   :  { %272 = dma.done.wait [#allocation4], 256  }
 0x1cf   :  { %273 = vsyncadd [#allocation4], 4294967040 }
 0x1d0   :  { %220 = vsyncpa [#allocation4], 1 }

</bundles_post_ra>
